<compile_context>
chip_gen: v5e
topology: v5e:2x2
jax: 0.10.0
libtpu: 0.0.40
codegen_flags: <defaults>
</compile_context>

<pallas_src>
import jax
import jax.numpy as jnp
from jax.experimental import pallas as pl
from jax.experimental.pallas import tpu as pltpu


# ----------------------------- config (small) ------------------------------
B = 2
T = 8
C = 128                                    # n_embd (lane-dense: multiple of 128)
MULTIPLE_OF = 256
# same default-intermediate formula as AllamoTransformerConfig / FeedForward
_I = int(2 * (4 * C) / 3)
INTERMEDIATE = MULTIPLE_OF * ((_I + MULTIPLE_OF - 1) // MULTIPLE_OF)   # 512


# --------------------------------- kernel -----------------------------------
def ffn_kernel(x_ref, wg_ref, bg_ref, wu_ref, bu_ref, wd_ref, bd_ref,
               o_ref, acc_ref):
    ii = pl.program_id(1)                                    # I-reduction step

    @pl.when(ii == 0)
    def _():
        acc_ref[...] = jnp.zeros_like(acc_ref)

    x = x_ref[...]                                           # (tm, C) bf16

    # Gate / up projections for this I-tile: two bf16 MXU matmuls, f32 acc.
    g = jnp.dot(x, wg_ref[...], preferred_element_type=jnp.float32) + bg_ref[...]
    u = jnp.dot(x, wu_ref[...], preferred_element_type=jnp.float32) + bu_ref[...]

    # SwiGLU elementwise math in f32 (v5e 's VPU/EUP have no bf16).
    h = (g * jax.nn.sigmoid(g)) * u                          # (tm, ti) f32

    # Partial down-projection contribution of this I-tile; accumulate in f32.
    acc_ref[...] += jnp.dot(h.astype(wd_ref.dtype), wd_ref[...],
                            preferred_element_type=jnp.float32)

    @pl.when(ii == pl.num_programs(1) - 1)
    def _():
        # Down bias added once, in the finalize branch only.
        o_ref[...] = (acc_ref[...] + bd_ref[...]).astype(o_ref.dtype)


# -------------------------------- wrapper ------------------------------------
def feed_forward(x, params, *, tm=256, ti=1024):
    """x: (B, T, C) f32.  params: wg/wu (C, I), wd (I, C), biases (1, ·)."""
    b, t, c = x.shape
    m = b * t
    x2 = x.reshape(m, c).astype(jnp.bfloat16)                # lane-dense bf16 slab

    wg = params["wg"].astype(jnp.bfloat16)
    wu = params["wu"].astype(jnp.bfloat16)
    wd = params["wd"].astype(jnp.bfloat16)
    bg = params["bg"].astype(jnp.float32)
    bu = params["bu"].astype(jnp.float32)
    bd = params["bd"].astype(jnp.float32)
    inter = wd.shape[0]

    tm = min(tm, m)                                          # row tile (MXU M)
    ti = min(ti, inter)                                      # I (reduction) tile
    assert m % tm == 0 and inter % ti == 0 and c % 128 == 0
    # TODO(synk): non-divisible M / I would need a padded boundary tile.

    grid = (m // tm, inter // ti)                            # reduction axis last

    out2 = pl.pallas_call(
        ffn_kernel,
        out_shape=jax.ShapeDtypeStruct((m, c), x.dtype),
        grid_spec=pltpu.PrefetchScalarGridSpec(
            num_scalar_prefetch=0,
            grid=grid,
            in_specs=[
                pl.BlockSpec((tm, c), lambda mi, ii: (mi, 0)),   # x rows (resident over I)
                pl.BlockSpec((c, ti), lambda mi, ii: (0, ii)),   # gate W tile
                pl.BlockSpec((1, ti), lambda mi, ii: (0, ii)),   # gate b tile
                pl.BlockSpec((c, ti), lambda mi, ii: (0, ii)),   # up   W tile
                pl.BlockSpec((1, ti), lambda mi, ii: (0, ii)),   # up   b tile
                pl.BlockSpec((ti, c), lambda mi, ii: (ii, 0)),   # down W tile
                pl.BlockSpec((1, c),  lambda mi, ii: (0, 0)),    # down b
            ],
            out_specs=pl.BlockSpec((tm, c), lambda mi, ii: (mi, 0)),
            scratch_shapes=[pltpu.VMEM((tm, c), jnp.float32)],   # f32 accumulator
        ),
        compiler_params=pltpu.CompilerParams(
            # M axis sharded across TensorCores (v7x), I axis is the reduction.
            dimension_semantics=("parallel", "arbitrary"),
            # Modest cap, safe on all generations; raise for production tiles
            # on v5e/v6e (128 MiB VMEM), keep <=~48 MiB on v7x (64 MiB VMEM).
            vmem_limit_bytes=48 * 1024 * 1024,
        ),
    )(x2, wg, bg, wu, bu, wd, bd)

    return out2.reshape(b, t, c)


# ------------------------- pure-JAX reference check --------------------------
def reference(x, params):
    g = x @ params["wg"] + params["bg"][0]
    u = x @ params["wu"] + params["bu"][0]
    return (jax.nn.silu(g) * u) @ params["wd"] + params["bd"][0]


# ----------------------------------- main ------------------------------------
if __name__ == "__main__":
    key = jax.random.PRNGKey(0)
    ks = jax.random.split(key, 8)

    def w(k, shape, std=0.02):
        return jax.random.normal(k, shape, jnp.float32) * std

    # Linear weights stored pre-transposed as (in_features, out_features)
    # so the kernel computes  h @ W + b  (same math as nn.Linear).
    params = {
        "wg": w(ks[0], (C, INTERMEDIATE)),
        "bg": w(ks[1], (1, INTERMEDIATE)),
        "wu": w(ks[2], (C, INTERMEDIATE)),
        "bu": w(ks[3], (1, INTERMEDIATE)),
        "wd": w(ks[4], (INTERMEDIATE, C)),
        "bd": w(ks[5], (1, C)),
    }

    x = jax.random.normal(ks[6], (B, T, C), jnp.float32)

    # ti=256 -> 2 reduction steps at the toy size, exercising the accumulator
    # init/finalize path; production would use ti=1024-2048 per generation.
    out = feed_forward(x, params, tm=256, ti=256)
    out = jax.block_until_ready(out)

    ref = reference(x, params)
    assert out.shape == (B, T, C)
    # bf16 MXU operands -> looser tolerance than pure-f32.
    assert jnp.allclose(out, ref, atol=2e-2, rtol=2e-2), \
        f"max err {jnp.max(jnp.abs(out - ref))}"

    print("KERNEL_OK")
</pallas_src>

<mosaic_0001>
module attributes {stable_mosaic.version = 11 : i64} {
  func.func @ffn_kernel(%arg0: i32, %arg1: i32, %arg2: memref<16x128xbf16, #tpu.memory_space<vmem>>, %arg3: memref<128x256xbf16, #tpu.memory_space<vmem>>, %arg4: memref<1x256xf32, #tpu.memory_space<vmem>>, %arg5: memref<128x256xbf16, #tpu.memory_space<vmem>>, %arg6: memref<1x256xf32, #tpu.memory_space<vmem>>, %arg7: memref<256x128xbf16, #tpu.memory_space<vmem>>, %arg8: memref<1x128xf32, #tpu.memory_space<vmem>>, %arg9: memref<16x128xf32, #tpu.memory_space<vmem>>, %arg10: memref<16x128xf32, #tpu.memory_space<vmem>>) attributes {dimension_semantics = [#tpu.dimension_semantics<parallel>, #tpu.dimension_semantics<arbitrary>], iteration_bounds = array<i64: 1, 2>, scalar_prefetch = 0 : i64, scratch_operands = 1 : i64, tpu.core_type = #tpu.core_type<tc>, window_params = [{transform_indices = @transform_0, window_bounds = array<i64: 16, 128>}, {transform_indices = @transform_1, window_bounds = array<i64: 128, 256>}, {transform_indices = @transform_2, window_bounds = array<i64: 1, 256>}, {transform_indices = @transform_3, window_bounds = array<i64: 128, 256>}, {transform_indices = @transform_4, window_bounds = array<i64: 1, 256>}, {transform_indices = @transform_5, window_bounds = array<i64: 256, 128>}, {pipeline_mode = #tpu.pipeline_mode<synchronous>, transform_indices = @transform_6, window_bounds = array<i64: 1, 128>}, {transform_indices = @transform_7, window_bounds = array<i64: 16, 128>}]} {
    %c0_i32 = arith.constant 0 : i32
    %0 = arith.cmpi eq, %arg1, %c0_i32 : i32
    %1 = arith.extui %0 : i1 to i32
    %c0_i32_0 = arith.constant 0 : i32
    %2 = arith.cmpi ne, %1, %c0_i32_0 : i32
    scf.if %2 {
      %cst_20 = arith.constant 0.000000e+00 : f32
      %30 = vector.broadcast %cst_20 : f32 to vector<16x128xf32>
      %c0_21 = arith.constant 0 : index
      %c0_22 = arith.constant 0 : index
      %31 = vector.load %arg10[%c0_21, %c0_22] : memref<16x128xf32, #tpu.memory_space<vmem>>, vector<16x128xf32>
      tpu.vector_store %arg10[%c0_21, %c0_22], %30 {strides = array<i32>} : memref<16x128xf32, #tpu.memory_space<vmem>>, vector<16x128xf32>,
    } else {
    }
    %c0 = arith.constant 0 : index
    %c0_1 = arith.constant 0 : index
    %3 = vector.load %arg2[%c0, %c0_1] : memref<16x128xbf16, #tpu.memory_space<vmem>>, vector<16x128xbf16>
    %c0_2 = arith.constant 0 : index
    %c0_3 = arith.constant 0 : index
    %4 = vector.load %arg3[%c0_2, %c0_3] : memref<128x256xbf16, #tpu.memory_space<vmem>>, vector<128x256xbf16>
    %cst = arith.constant dense<0.000000e+00> : vector<16x256xf32>
    %5 = tpu.matmul %3, %4, %cst {dimension_numbers = #tpu.dot_dimension_numbers<[1], [0], [0], [1], [0, 0, 1, 1], [], []>} : vector<16x128xbf16>, vector<128x256xbf16>, vector<16x256xf32> -> vector<16x256xf32>
    %c0_4 = arith.constant 0 : index
    %c0_5 = arith.constant 0 : index
    %6 = vector.load %arg4[%c0_4, %c0_5] : memref<1x256xf32, #tpu.memory_space<vmem>>, vector<1x256xf32>
    %7 = vector.broadcast %6 : vector<1x256xf32> to vector<16x256xf32>
    %8 = arith.addf %5, %7 : vector<16x256xf32>
    %c0_6 = arith.constant 0 : index
    %c0_7 = arith.constant 0 : index
    %9 = vector.load %arg5[%c0_6, %c0_7] : memref<128x256xbf16, #tpu.memory_space<vmem>>, vector<128x256xbf16>
    %cst_8 = arith.constant dense<0.000000e+00> : vector<16x256xf32>
    %10 = tpu.matmul %3, %9, %cst_8 {dimension_numbers = #tpu.dot_dimension_numbers<[1], [0], [0], [1], [0, 0, 1, 1], [], []>} : vector<16x128xbf16>, vector<128x256xbf16>, vector<16x256xf32> -> vector<16x256xf32>
    %c0_9 = arith.constant 0 : index
    %c0_10 = arith.constant 0 : index
    %11 = vector.load %arg6[%c0_9, %c0_10] : memref<1x256xf32, #tpu.memory_space<vmem>>, vector<1x256xf32>
    %12 = vector.broadcast %11 : vector<1x256xf32> to vector<16x256xf32>
    %13 = arith.addf %10, %12 : vector<16x256xf32>
    %14 = arith.negf %8 : vector<16x256xf32>
    %15 = math.exp %14 : vector<16x256xf32>
    %cst_11 = arith.constant 1.000000e+00 : f32
    %16 = vector.broadcast %cst_11 : f32 to vector<16x256xf32>
    %17 = arith.addf %16, %15 : vector<16x256xf32>
    %18 = arith.divf %16, %17 : vector<16x256xf32>
    %19 = arith.mulf %8, %18 : vector<16x256xf32>
    %20 = arith.mulf %19, %13 : vector<16x256xf32>
    %c0_12 = arith.constant 0 : index
    %c0_13 = arith.constant 0 : index
    %21 = vector.load %arg10[%c0_12, %c0_13] : memref<16x128xf32, #tpu.memory_space<vmem>>, vector<16x128xf32>
    %22 = arith.truncf %20 : vector<16x256xf32> to vector<16x256xbf16>
    %c0_14 = arith.constant 0 : index
    %c0_15 = arith.constant 0 : index
    %23 = vector.load %arg7[%c0_14, %c0_15] : memref<256x128xbf16, #tpu.memory_space<vmem>>, vector<256x128xbf16>
    %cst_16 = arith.constant dense<0.000000e+00> : vector<16x128xf32>
    %24 = tpu.matmul %22, %23, %cst_16 {dimension_numbers = #tpu.dot_dimension_numbers<[1], [0], [0], [1], [0, 0, 1, 1], [], []>} : vector<16x256xbf16>, vector<256x128xbf16>, vector<16x128xf32> -> vector<16x128xf32>
    %25 = arith.addf %21, %24 : vector<16x128xf32>
    %c0_17 = arith.constant 0 : index
    %c0_18 = arith.constant 0 : index
    %26 = vector.load %arg10[%c0_17, %c0_18] : memref<16x128xf32, #tpu.memory_space<vmem>>, vector<16x128xf32>
    tpu.vector_store %arg10[%c0_17, %c0_18], %25 {strides = array<i32>} : memref<16x128xf32, #tpu.memory_space<vmem>>, vector<16x128xf32>,
    %c1_i32 = arith.constant 1 : i32
    %27 = arith.cmpi eq, %arg1, %c1_i32 : i32
    %28 = arith.extui %27 : i1 to i32
    %c0_i32_19 = arith.constant 0 : i32
    %29 = arith.cmpi ne, %28, %c0_i32_19 : i32
    scf.if %29 {
      %c0_20 = arith.constant 0 : index
      %c0_21 = arith.constant 0 : index
      %30 = vector.load %arg10[%c0_20, %c0_21] : memref<16x128xf32, #tpu.memory_space<vmem>>, vector<16x128xf32>
      %c0_22 = arith.constant 0 : index
      %c0_23 = arith.constant 0 : index
      %31 = vector.load %arg8[%c0_22, %c0_23] : memref<1x128xf32, #tpu.memory_space<vmem>>, vector<1x128xf32>
      %32 = vector.broadcast %31 : vector<1x128xf32> to vector<16x128xf32>
      %33 = arith.addf %30, %32 : vector<16x128xf32>
      %c0_24 = arith.constant 0 : index
      %c0_25 = arith.constant 0 : index
      %34 = vector.load %arg9[%c0_24, %c0_25] : memref<16x128xf32, #tpu.memory_space<vmem>>, vector<16x128xf32>
      tpu.vector_store %arg9[%c0_24, %c0_25], %33 {strides = array<i32>} : memref<16x128xf32, #tpu.memory_space<vmem>>, vector<16x128xf32>,
    } else {
    }
    return
  }
  func.func @transform_0(%arg0: i32, %arg1: i32) -> (i32, i32) {
    %c0_i32 = arith.constant 0 : i32
    %c0_i32_0 = arith.constant 0 : i32
    return %arg0, %c0_i32 : i32, i32
  }
  func.func @transform_1(%arg0: i32, %arg1: i32) -> (i32, i32) {
    %c0_i32 = arith.constant 0 : i32
    %c0_i32_0 = arith.constant 0 : i32
    return %c0_i32, %arg1 : i32, i32
  }
  func.func @transform_2(%arg0: i32, %arg1: i32) -> (i32, i32) {
    %c0_i32 = arith.constant 0 : i32
    %c0_i32_0 = arith.constant 0 : i32
    return %c0_i32, %arg1 : i32, i32
  }
  func.func @transform_3(%arg0: i32, %arg1: i32) -> (i32, i32) {
    %c0_i32 = arith.constant 0 : i32
    %c0_i32_0 = arith.constant 0 : i32
    return %c0_i32, %arg1 : i32, i32
  }
  func.func @transform_4(%arg0: i32, %arg1: i32) -> (i32, i32) {
    %c0_i32 = arith.constant 0 : i32
    %c0_i32_0 = arith.constant 0 : i32
    return %c0_i32, %arg1 : i32, i32
  }
  func.func @transform_5(%arg0: i32, %arg1: i32) -> (i32, i32) {
    %c0_i32 = arith.constant 0 : i32
    %c0_i32_0 = arith.constant 0 : i32
    return %arg1, %c0_i32 : i32, i32
  }
  func.func @transform_6(%arg0: i32, %arg1: i32) -> (i32, i32) {
    %c0_i32 = arith.constant 0 : i32
    %c0_i32_0 = arith.constant 0 : i32
    %c0_i32_1 = arith.constant 0 : i32
    return %c0_i32, %c0_i32_0 : i32, i32
  }
  func.func @transform_7(%arg0: i32, %arg1: i32) -> (i32, i32) {
    %c0_i32 = arith.constant 0 : i32
    %c0_i32_0 = arith.constant 0 : i32
    return %arg0, %c0_i32 : i32, i32
  }
}

</mosaic_0001>

<bundles_post_ra>
// kernel: tpu_custom_call.1
= control target key start
LH: loop header
LB: loop body
LE: loop exit
PB: predicated region body
PF: predicated region fallthrough
CT: control target
= control target key end

     0   :  { %s2235_s0 = inlined_call_operand.hbm [shape: bf16[16,128], index: 0, kind: input, shape index: {}]   ;;  %s2236_s1 = inlined_call_operand.hbm [shape: bf16[128,512], index: 1, kind: input, shape index: {}]   ;;  %s2237_s2 = inlined_call_operand.hbm [shape: f32[1,512], index: 2, kind: input, shape index: {}]   ;;  %s2238_s3 = inlined_call_operand.hbm [shape: bf16[128,512], index: 3, kind: input, shape index: {}]   ;;  %s2239_s4 = inlined_call_operand.hbm [shape: f32[1,512], index: 4, kind: input, shape index: {}]   ;;  %s2240_s5 = inlined_call_operand.hbm [shape: bf16[512,128], index: 5, kind: input, shape index: {}]   ;;  %s2241_s6 = inlined_call_operand.vmem [shape: f32[1,128], index: 6, kind: input, shape index: {}]   ;;  %s2242_s7 = inlined_call_operand.hbm [shape: f32[16,128], index: 7, kind: output, shape index: {}]  }
   0x1   :  { %2246 = sst [smem:[#allocation24_spill]] %s2235_s0 }
   0x2   :  { %2247 = sst [smem:[#allocation25_spill]] %s2236_s1 }
   0x3   :  { %2248 = sst [smem:[#allocation26_spill]] %s2237_s2 }
   0x4   :  { %2249 = sst [smem:[#allocation27_spill]] %s2238_s3 }
   0x5   :  { %2250 = sst [smem:[#allocation28_spill]] %s2241_s6 }
   0x6   :  { %2251 = sst [smem:[#allocation29_spill]] %s2242_s7 }
   0x7   :  { %12 = vsyncpa [#allocation4], 0 }
   0x8   :  { %13 = vsyncpa [#allocation7], 0 }
   0x9   :  { %15 = vsyncpa [#allocation7 + $0x1], 0 }
   0xa   :  { %16 = vsyncpa [#allocation10], 0 }
   0xb   :  { %18 = vsyncpa [#allocation10 + $0x1], 0 }
   0xc   :  { %19 = vsyncpa [#allocation13], 0 }
   0xd   :  { %21 = vsyncpa [#allocation13 + $0x1], 0 }
   0xe   :  { %22 = vsyncpa [#allocation5], 0  ;;  %s1929_s24 = smov 0   ;;  %s1931_s25 = smov 0  }
   0xf   :  { %s1933_s26 = smov 0   ;;  %s1935_s27 = smov 0  }
  0x10   :  { %s1937_s28 = smov 0   ;;  %s1939_s29 = smov 0  }
  0x11 LB: > { %2252 = sst [smem:[#allocation20_spill]] %s1865_s26  ;;  %s37_s30 = sadd.s32 1, %s1873_s28  ;;  %s1877_s29 = sphi %s1939_s29, %s28_s29   ;;  %s1873_s28 = sphi %s1937_s28, %s2277_s28   ;;  %s1869_s27 = sphi %s1935_s27, %s2276_s27   ;;  %s1865_s26 = sphi %s1933_s26, %s2272_s26   ;;  %s1861_s25 = sphi %s1931_s25, %s2275_s25   ;;  %s1857_s24 = sphi %s1929_s24, %s2274_s24  }
  0x12   : > { %2253 = sst [smem:[#allocation21_spill]] %s1877_s29  ;;  %s73_s8 = sadd.s32 1, %s1865_s26 }
  0x13   : > { %p38_p0 = scmp.ge.s32.totalorder %s37_s30, 2  ;;  %p80_p1 = scmp.ne.s32.totalorder %s1865_s26, %s1861_s25 }
  0x14   : > { %p81_p2 = scmp.eq.s32.totalorder %s1877_s29, 0  ;;  %p1524_p4 = scmp.lt.s32.totalorder %s1877_s29, 2 }
  0x15   : > { %s2279_s30 = smov (%p38_p0, %s37_s30), 0  ;;  %s281_s11 = sand.u32 1, %s1877_s29  }
  0x16   : > { %2254 = sst [smem:[#allocation22_spill]] %s2279_s30  ;;  %p1966_p3 = por %p81_p2, %p80_p1 }
  0x17   : > { %s70_s10 = ssub.s32 %s1873_s28, %s2279_s30  ;;  %s1975_s12 = sand.u32 1, %s1865_s26  }
  0x18   : > { %p71_p5 = scmp.eq.s32.totalorder %s70_s10, 0  ;;  %s1433_s13 = sshll.u32 %s1873_s28, 3 }
  0x19   : > { %s1982_s15 = sshll.u32 %s1975_s12, 7  ;;  %s2257_s1 = sld [smem:[#allocation25_spill]] }
  0x1a   : > { %s1979_s14 = scalar_select %p71_p5, %s1865_s26, %s73_s8  }
  0x1b   : > { %s285_s20 = scalar_lea.vmem [#allocation6], %s1982_s15  ;;  %p1992_p6 = pnand %p1524_p4, %p1966_p3 }
  0x1c   : > { %2256 = sst [smem:[#allocation23_spill]] %s1979_s14  ;;  %s293_s21 = sshll.u32 %s285_s20, 4  ;;  %s294_s21 = int_to_ptr.vmem [resolvable:$true] %s293_s21 }
  0x1d   : > { %s1996_s23 = scalar_lea.sflag [#allocation7], %s281_s11  ;;  %s1879_s8 = smov 256  }
  0x1e   : > { %s1880_s10 = smov 128   ;;  %s1881_s16 = smov 8  }
  0x1f   : > { %s290_s18 = scalar_lea.hbm %s2257_s1, %s1433_s13  ;;  %s2259_s3 = sld [smem:[#allocation27_spill]] }
  0x20   : > { %s291_s19 = sshll.u32 %s290_s18, 4  ;;  %s326_s20 = scalar_lea.vmem [#allocation9], %s1982_s15  ;;  %s292_s19 = int_to_ptr.hbm [resolvable:$true] %s291_s19 }
  0x21   : > { %1510 = dma.hbm_to_vmem [thread:$0]  (!%p1992_p6), %s292_s19, 2048, %s294_s21, %s1996_s23, %s1879_s8, %s1880_s10, %s1881_s16  }
  0x22   : > { %s334_s1 = sshll.u32 %s326_s20, 4  ;;  %s2005_s14 = scalar_lea.sflag [#allocation10], %s281_s11  ;;  %s335_s1 = int_to_ptr.vmem [resolvable:$true] %s334_s1 }
  0x23   : > { %s2011_s26 = sadd.s32 4294967295, %s1877_s29   ;;  %p86_p7 = scmp.ne.s32.totalorder %s1861_s25, %s1857_s24 }
  0x24   : > { %p87_p8 = scmp.eq.s32.totalorder %s2011_s26, 0  ;;  %p1204_p9 = scmp.ge.s32.totalorder %s1877_s29, 1 }
  0x25   : > { %s331_s18 = scalar_lea.hbm %s2259_s3, %s1433_s13  ;;  %p248_p10 = scmp.lt.s32.totalorder %s1877_s29, 3 }
  0x26   : > { %s332_s30 = sshll.u32 %s331_s18, 4  ;;  %p2020_p11 = por %p87_p8, %p86_p7  ;;  %s333_s30 = int_to_ptr.hbm [resolvable:$true] %s332_s30 }
  0x27   : > { %1516 = dma.hbm_to_vmem [thread:$0]  (!%p1992_p6), %s333_s30, 2048, %s335_s1, %s2005_s14, %s1879_s8, %s1880_s10, %s1881_s16  }
  0x28   : > { %p2024_p12 = pnand %p1204_p9, %p248_p10  ;;  %s2262_s0 = sld [smem:[#allocation24_spill]] }
  0x29   : > { %s1882_s24 = smov [#allocation3]   ;;  %s1210_s8 = sshll.u32 %s1975_s12, 1 }
  0x2a   : > { %p1503_p13 = pneg %p2024_p12  ;;  %s264_s21 = sshll.u32 %s1882_s24, 4  ;;  %s265_s21 = int_to_ptr.vmem [resolvable:$true] %s264_s21 }
  0x2b   : > { %s1211_s10 = sshll.u32 %s1873_s28, 1  ;;  %s1883_s16 = smov 64  }
  0x2c   : > { %p1504_p0 = pnand %p1503_p13, %p87_p8  ;;  %s1884_s9 = smov 4  }
  0x2d   : > { %s2263_s2 = sld [smem:[#allocation26_spill]]  ;;  %s307_s1 = scalar_lea.vmem [#allocation8], %s1210_s8 }
  0x2e   : > { %s262_s19 = sshll.u32 %s2262_s0, 4  ;;  %s315_s30 = sshll.u32 %s307_s1, 4  ;;  %s263_s19 = int_to_ptr.hbm [resolvable:$true] %s262_s19  ;;  %s316_s30 = int_to_ptr.vmem [resolvable:$true] %s315_s30 }
  0x2f   : > { %1506 = dma.hbm_to_vmem [thread:$0]  (!%p1504_p0), %s263_s19, 128, %s265_s21, [#allocation4], %s1883_s16, %s1883_s16, %s1884_s9  }
  0x30   : > { %s352_s29 = scalar_lea.hbm %s2239_s4, %s1211_s10  ;;  %s348_s7 = scalar_lea.vmem [#allocation11], %s1210_s8 }
  0x31   : > { %s356_s19 = sshll.u32 %s348_s7, 4  ;;  %s354_s21 = sshll.u32 %s352_s29, 4  ;;  %s357_s19 = int_to_ptr.vmem [resolvable:$true] %s356_s19  ;;  %s355_s21 = int_to_ptr.hbm [resolvable:$true] %s354_s21 }
  0x32   : > { %1519 = dma.hbm_to_vmem [thread:$0]  (!%p1992_p6), %s355_s21, 32, %s357_s19, %s2005_s14  }
  0x33   : > { %s311_s20 = scalar_lea.hbm %s2263_s2, %s1211_s10  ;;  %s1435_s17 = sshll.u32 %s1873_s28, 7 }
  0x34   : > { %s313_s0 = sshll.u32 %s311_s20, 4  ;;  %s372_s1 = scalar_lea.hbm %s2240_s5, %s1435_s17  ;;  %s314_s0 = int_to_ptr.hbm [resolvable:$true] %s313_s0 }
  0x35   : > { %1513 = dma.hbm_to_vmem [thread:$0]  (!%p1992_p6), %s314_s0, 32, %s316_s30, %s1996_s23  }
  0x36   : > { %s367_s2 = scalar_lea.vmem [#allocation12], %s1982_s15  ;;  %s373_s0 = sshll.u32 %s372_s1, 4  ;;  %s374_s0 = int_to_ptr.hbm [resolvable:$true] %s373_s0 }
  0x37   : > { %s375_s6 = sshll.u32 %s367_s2, 4  ;;  %s364_s3 = scalar_lea.sflag [#allocation13], %s1975_s12  ;;  %s376_s6 = int_to_ptr.vmem [resolvable:$true] %s375_s6 }
  0x38   : > { %1522 = dma.hbm_to_vmem [thread:$0]  (!%p1992_p6), %s374_s0, 2048, %s376_s6, %s364_s3, %s1883_s16, %s1883_s16, %s1884_s9  }
  0x39   : > { %387 = sbr.rel (%p2024_p12) target bundleno = 449 (0x1c1), region = 48 }
  0x3e   : > { %1836 = dma.done.wait (%p87_p8), [#allocation4], 128  }
  0x3f   : > { %1838 = vsyncadd (%p87_p8), [#allocation4], 4294967168  ;;  %s394_s7 = sand.u32 1, %s2011_s26   ;;  %s396_s2 = sand.u32 1, %s1861_s25  }
  0x40   : > { %s1222_s29 = sshll.u32 %s396_s2, 7  ;;  %s395_s14 = scalar_lea.sflag [#allocation7], %s394_s7 }
  0x41   : > { %s2065_s15 = scalar_lea.vmem [#allocation6], %s1222_s29 }
  0x42   : > { %1840 = dma.done.wait (%p2020_p11), %s395_s14, 2080  }
  0x43   : > { %1842 = vsyncadd (%p2020_p11), %s395_s14, 4294965216  ;;  %s1223_s6 = sshll.u32 %s396_s2, 1  ;;  %s415_s22 = scalar_lea.sflag [#allocation10], %s394_s7 }
  0x44   : > { %s2071_s12 = scalar_lea.vmem [#allocation8], %s1223_s6  ;;  %s2073_s23 = scalar_lea.vmem [#allocation9], %s1222_s29 }
  0x45   : > { %1844 = dma.done.wait (%p2020_p11), %s415_s22, 2080  }
  0x46   : > { %1846 = vsyncadd (%p2020_p11), %s415_s22, 4294965216  ;;  %s2079_s11 = scalar_lea.vmem [#allocation11], %s1223_s6  ;;  %s435_s8 = scalar_lea.sflag [#allocation13], %s396_s2 }
  0x47   : > { %s2081_s10 = scalar_lea.vmem [#allocation12], %s1222_s29 }
  0x48   : > { %1848 = dma.done.wait (%p2020_p11), %s435_s8, 2048  }
  0x49   : > { %1850 = vsyncadd (%p2020_p11), %s435_s8, 4294965248  ;;  %p1227_p1 = scmp.ne.s32.totalorder %s1869_s27, 0 }
  0x4b   : > { %495 = sbr.rel (%p1227_p1) target bundleno = 83 (0x53), region = 76 }
  0x50   : > { %v1885_v0 = vmov 0.0  }
  0x51   : > { %496 = vst [vmem:[#allocation2] sm:$0xff] %v1885_v0 }
  0x52   : > { %497 = vst [vmem:[#allocation2 + $0x8] sm:$0xff] %v1885_v0 }
  0x53 PF: > { %v1290_v1 = vld [vmem:[%s2065_s15 + $0x70] sm:$0xf]  ;;  %v1452_v2 = vld [vmem:[%s2065_s15 + $0x74] sm:$0xf0]  ;;  %v1451_v3 = vld [vmem:[%s2065_s15 + $0x74] sm:$0xf] }
  0x54   : > { %v1291_v4 = vor.u32 %v1452_v2, %v1290_v1  ;;  %v1292_v5 = vld [vmem:[%s2065_s15 + $0x78] sm:$0xf0]  ;;  %v1282_v6 = vld [vmem:[%s2065_s15 + $0x60] sm:$0xf]  ;;  %v1450_v7 = vld [vmem:[%s2065_s15 + $0x64] sm:$0xf0] }
  0x55   : > { %v1295_v8 = vor.u32 %v1451_v3, %v1292_v5  ;;  %v1449_v9 = vld [vmem:[%s2065_s15 + $0x64] sm:$0xf]  ;;  %v1284_v10 = vld [vmem:[%s2065_s15 + $0x68] sm:$0xf0]  ;;  %v1283_v11 = vor.u32 %v1450_v7, %v1282_v6  ;;  %v1274_v13 = vld [vmem:[%s2065_s15 + $0x50] sm:$0xf] }
  0x56   : > { %608 = vmatpush.bf16.msra.mxu0 %v1291_v4  ;;  %v1287_v12 = vor.u32 %v1449_v9, %v1284_v10  ;;  %v1448_v14 = vld [vmem:[%s2065_s15 + $0x54] sm:$0xf0]  ;;  %v1447_v15 = vld [vmem:[%s2065_s15 + $0x54] sm:$0xf]  ;;  %v1276_v16 = vld [vmem:[%s2065_s15 + $0x58] sm:$0xf0] }
  0x57   : > { %622 = vmatpush.bf16.msra.mxu1 %v1295_v8  ;;  %v1354_v17 = vld [vmem:[%s2073_s23 + $0x70] sm:$0xf]  ;;  %v1275_v18 = vor.u32 %v1448_v14, %v1274_v13  ;;  %v1468_v19 = vld [vmem:[%s2073_s23 + $0x74] sm:$0xf0]  ;;  %v1467_v20 = vld [vmem:[%s2073_s23 + $0x74] sm:$0xf]  ;;  %v1279_v22 = vor.u32 %v1447_v15, %v1276_v16 }
  0x58   : > { %v1356_v21 = vld [vmem:[%s2073_s23 + $0x78] sm:$0xf0]  ;;  %v1446_v24 = vld [vmem:[%s2065_s15 + $0x44] sm:$0xf0]  ;;  %v1445_v25 = vld [vmem:[%s2065_s15 + $0x44] sm:$0xf]  ;;  %v1355_v26 = vor.u32 %v1468_v19, %v1354_v17 }
  0x59   : > { %v1266_v23 = vld [vmem:[%s2065_s15 + $0x40] sm:$0xf]  ;;  %v1359_v27 = vor.u32 %v1467_v20, %v1356_v21  ;;  %v1268_v28 = vld [vmem:[%s2065_s15 + $0x48] sm:$0xf0]  ;;  %v1346_v29 = vld [vmem:[%s2073_s23 + $0x60] sm:$0xf] }
  0x5a   : > { %609 = vmatpush.bf16.msra.mxu0 %v1283_v11  ;;  %v1466_v30 = vld [vmem:[%s2073_s23 + $0x64] sm:$0xf0]  ;;  %738 = vmatpush.bf16.msra.mxu2 %v1355_v26  ;;  %v1465_v32 = vld [vmem:[%s2073_s23 + $0x64] sm:$0xf]  ;;  %v1348_v33 = vld [vmem:[%s2073_s23 + $0x68] sm:$0xf0]  ;;  %v1267_v34 = vor.u32 %v1446_v24, %v1266_v23  ;;  %v1271_v38 = vor.u32 %v1445_v25, %v1268_v28 }
  0x5b   : > { %623 = vmatpush.bf16.msra.mxu1 %v1287_v12  ;;  %752 = vmatpush.bf16.msra.mxu3 %v1359_v27  ;;  %v1347_v31 = vor.u32 %v1466_v30, %v1346_v29  ;;  %v1258_v35 = vld [vmem:[%s2065_s15 + $0x30] sm:$0xf]  ;;  %v1444_v36 = vld [vmem:[%s2065_s15 + $0x34] sm:$0xf0]  ;;  %v1351_v37 = vor.u32 %v1465_v32, %v1348_v33  ;;  %v1338_v39 = vld [vmem:[%s2073_s23 + $0x50] sm:$0xf] }
  0x5c   : > { %v1464_v40 = vld [vmem:[%s2073_s23 + $0x54] sm:$0xf0]  ;;  %v1463_v41 = vld [vmem:[%s2073_s23 + $0x54] sm:$0xf]  ;;  %v1443_v42 = vld [vmem:[%s2065_s15 + $0x34] sm:$0xf]  ;;  %v1259_v48 = vor.u32 %v1444_v36, %v1258_v35 }
  0x5d   : > { %v1260_v43 = vld [vmem:[%s2065_s15 + $0x38] sm:$0xf0]  ;;  %v1340_v44 = vld [vmem:[%s2073_s23 + $0x58] sm:$0xf0]  ;;  %v1339_v45 = vor.u32 %v1464_v40, %v1338_v39  ;;  %v1330_v47 = vld [vmem:[%s2073_s23 + $0x40] sm:$0xf] }
  0x5e   : > { %610 = vmatpush.bf16.msra.mxu0 %v1275_v18  ;;  %739 = vmatpush.bf16.msra.mxu2 %v1347_v31  ;;  %v1343_v46 = vor.u32 %v1463_v41, %v1340_v44  ;;  %v1462_v49 = vld [vmem:[%s2073_s23 + $0x44] sm:$0xf0]  ;;  %v1461_v50 = vld [vmem:[%s2073_s23 + $0x44] sm:$0xf]  ;;  %v1332_v51 = vld [vmem:[%s2073_s23 + $0x48] sm:$0xf0]  ;;  %v1263_v52 = vor.u32 %v1443_v42, %v1260_v43 }
  0x5f   : > { %624 = vmatpush.bf16.msra.mxu1 %v1279_v22  ;;  %753 = vmatpush.bf16.msra.mxu3 %v1351_v37  ;;  %v1250_v53 = vld [vmem:[%s2065_s15 + $0x20] sm:$0xf]  ;;  %v1442_v54 = vld [vmem:[%s2065_s15 + $0x24] sm:$0xf0]  ;;  %v1441_v55 = vld [vmem:[%s2065_s15 + $0x24] sm:$0xf]  ;;  %v1331_v57 = vor.u32 %v1462_v49, %v1330_v47  ;;  %v1335_v58 = vor.u32 %v1461_v50, %v1332_v51 }
  0x60   : > { %v1252_v56 = vld [vmem:[%s2065_s15 + $0x28] sm:$0xf0]  ;;  %v1322_v59 = vld [vmem:[%s2073_s23 + $0x30] sm:$0xf]  ;;  %v1251_v60 = vor.u32 %v1442_v54, %v1250_v53  ;;  %v1460_v61 = vld [vmem:[%s2073_s23 + $0x34] sm:$0xf0] }
  0x61   : > { %v1459_v62 = vld [vmem:[%s2073_s23 + $0x34] sm:$0xf]  ;;  %v1324_v63 = vld [vmem:[%s2073_s23 + $0x38] sm:$0xf0]  ;;  %v1255_v0 = vor.u32 %v1441_v55, %v1252_v56  ;;  %v1242_v1 = vld [vmem:[%s2065_s15 + $0x10] sm:$0xf]  ;;  %v1323_v5 = vor.u32 %v1460_v61, %v1322_v59 }
  0x62   : > { %611 = vmatpush.bf16.msra.mxu0 %v1267_v34  ;;  %740 = vmatpush.bf16.msra.mxu2 %v1339_v45  ;;  %v1440_v2 = vld [vmem:[%s2065_s15 + $0x14] sm:$0xf0]  ;;  %v1439_v3 = vld [vmem:[%s2065_s15 + $0x14] sm:$0xf]  ;;  %v1244_v4 = vld [vmem:[%s2065_s15 + $0x18] sm:$0xf0]  ;;  %v1327_v6 = vor.u32 %v1459_v62, %v1324_v63 }
  0x63   : > { %625 = vmatpush.bf16.msra.mxu1 %v1271_v38  ;;  %754 = vmatpush.bf16.msra.mxu3 %v1343_v46  ;;  %v1314_v7 = vld [vmem:[%s2073_s23 + $0x20] sm:$0xf]  ;;  %v1243_v8 = vor.u32 %v1440_v2, %v1242_v1  ;;  %v1458_v9 = vld [vmem:[%s2073_s23 + $0x24] sm:$0xf0]  ;;  %v1457_v10 = vld [vmem:[%s2073_s23 + $0x24] sm:$0xf]  ;;  %v1247_v12 = vor.u32 %v1439_v3, %v1244_v4 }
  0x64   : > { %v1316_v11 = vld [vmem:[%s2073_s23 + $0x28] sm:$0xf0]  ;;  %v1234_v13 = vld [vmem:[%s2065_s15] sm:$0xf]  ;;  %v1438_v14 = vld [vmem:[%s2065_s15 + $0x4] sm:$0xf0]  ;;  %v1315_v17 = vor.u32 %v1458_v9, %v1314_v7 }
  0x65   : > { %v1437_v15 = vld [vmem:[%s2065_s15 + $0x4] sm:$0xf]  ;;  %v1236_v16 = vld [vmem:[%s2065_s15 + $0x8] sm:$0xf0]  ;;  %v1319_v18 = vor.u32 %v1457_v10, %v1316_v11  ;;  %v1235_v19 = vor.u32 %v1438_v14, %v1234_v13  ;;  %v1306_v20 = vld [vmem:[%s2073_s23 + $0x10] sm:$0xf] }
  0x66   : > { %612 = vmatpush.bf16.msra.mxu0 %v1259_v48  ;;  %741 = vmatpush.bf16.msra.mxu2 %v1331_v57  ;;  %v1456_v21 = vld [vmem:[%s2073_s23 + $0x14] sm:$0xf0]  ;;  %v1239_v22 = vor.u32 %v1437_v15, %v1236_v16  ;;  %v1455_v23 = vld [vmem:[%s2073_s23 + $0x14] sm:$0xf]  ;;  %v1308_v24 = vld [vmem:[%s2073_s23 + $0x18] sm:$0xf0] }
  0x67   : > { %626 = vmatpush.bf16.msra.mxu1 %v1263_v52  ;;  %755 = vmatpush.bf16.msra.mxu3 %v1335_v58  ;;  %v1436_v25 = vld [vmem:[#allocation3] sm:$0xff]  ;;  %v1307_v26 = vor.u32 %v1456_v21, %v1306_v20  ;;  %v1311_v27 = vor.u32 %v1455_v23, %v1308_v24  ;;  %v1298_v28 = vld [vmem:[%s2073_s23] sm:$0xf]  ;;  %v1454_v29 = vld [vmem:[%s2073_s23 + $0x4] sm:$0xf0]  ;;  %p1428_p2 = scmp.ne.s32.totalorder %s1869_s27, 1 }
  0x68   : > { %v1453_v30 = vld [vmem:[%s2073_s23 + $0x4] sm:$0xf]  ;;  %v1300_v31 = vld [vmem:[%s2073_s23 + $0x8] sm:$0xf0]  ;;  %v1299_v32 = vor.u32 %v1454_v29, %v1298_v28  ;;  %v1476_v34 = vld [vmem:[%s2081_s10 + $0x38] sm:$0xff]  ;;  %s2268_s9 = sld [smem:[#allocation28_spill]] (!%p1428_p2) }
  0x69   : > { %v1303_v33 = vor.u32 %v1453_v30, %v1300_v31  ;;  %v1484_v35 = vld [vmem:[%s2081_s10 + $0x78] sm:$0xff]  ;;  %v1475_v36 = vld [vmem:[%s2081_s10 + $0x30] sm:$0xff]  ;;  %v1474_v38 = vld [vmem:[%s2081_s10 + $0x28] sm:$0xff] }
  0x6a   : > { %613 = vmatpush.bf16.msra.mxu0 %v1251_v60  ;;  %742 = vmatpush.bf16.msra.mxu2 %v1323_v5  ;;  %v1483_v37 = vld [vmem:[%s2081_s10 + $0x70] sm:$0xff]  ;;  %v1482_v39 = vld [vmem:[%s2081_s10 + $0x68] sm:$0xff]  ;;  %v516_v40 = vld [vmem:[%s2071_s12] sm:$0x3] }
  0x6b   : > { %627 = vmatpush.bf16.msra.mxu1 %v1255_v0  ;;  %756 = vmatpush.bf16.msra.mxu3 %v1327_v6  ;;  %v1473_v41 = vld [vmem:[%s2081_s10 + $0x20] sm:$0xff]  ;;  %v518_v43 = vperm.slane %v516_v40, 0  ;;  %v519_v44 = vperm.slane %v516_v40, 1  ;;  %v1472_v46 = vld [vmem:[%s2081_s10 + $0x18] sm:$0xff]  ;;  %v1471_v53 = vld [vmem:[%s2081_s10 + $0x10] sm:$0xff] }
  0x6c   : > { %v1481_v42 = vld [vmem:[%s2081_s10 + $0x60] sm:$0xff]  ;;  %v1480_v47 = vld [vmem:[%s2081_s10 + $0x58] sm:$0xff]  ;;  %v1479_v54 = vld [vmem:[%s2081_s10 + $0x50] sm:$0xff] }
  0x6d   : > { %v1470_v56 = vld [vmem:[%s2081_s10 + $0x8] sm:$0xff]  ;;  %v1469_v2 = vld [vmem:[%s2081_s10] sm:$0xff] }
  0x6e   : > { %614 = vmatpush.bf16.msra.mxu0 %v1243_v8  ;;  %743 = vmatpush.bf16.msra.mxu2 %v1315_v17  ;;  %v1478_v57 = vld [vmem:[%s2081_s10 + $0x48] sm:$0xff]  ;;  %v1477_v3 = vld [vmem:[%s2081_s10 + $0x40] sm:$0xff]  ;;  %v2185_v17 = vld [vmem:[%s2079_s11] sm:$0x3] }
  0x6f   : > { %628 = vmatpush.bf16.msra.mxu1 %v1247_v12  ;;  %757 = vmatpush.bf16.msra.mxu3 %v1319_v18  ;;  %v654_v24 = vperm.slane %v2185_v17, 0  ;;  %v655_v29 = vperm.slane %v2185_v17, 1 }
  0x72   : > { %615 = vmatpush.bf16.msra.mxu0 %v1235_v19  ;;  %744 = vmatpush.bf16.msra.mxu2 %v1307_v26 }
  0x73   : > { %629 = vmatpush.bf16.msra.mxu1 %v1239_v22  ;;  %758 = vmatpush.bf16.msra.mxu3 %v1311_v27 }
  0x75   : > { %616 = vmatmul.bf16.vlgmr.msra.gmra.mxu0 %v1436_v25 }
  0x76   : > { %630 = vmatmul.bf16.vlgmr.msra.gmra.mxu1 %v1436_v25  ;;  %745 = vmatpush.bf16.msra.mxu2 %v1299_v32 }
  0x77   : > { %759 = vmatpush.bf16.msra.mxu3 %v1303_v33  ;;  %982 = vmatpush.bf16.msrb.mxu0 %v1476_v34 }
  0x78   : > { %996 = vmatpush.bf16.msrb.mxu1 %v1484_v35 }
  0x79   : > { %746 = vmatmul.bf16.vlgmr.msra.gmra.mxu2 %v1436_v25 }
  0x7a   : > { %760 = vmatmul.bf16.vlgmr.msra.gmra.mxu3 %v1436_v25 }
  0x7b   : > { %983 = vmatpush.bf16.msrb.mxu0 %v1475_v36 }
  0x7c   : > { %997 = vmatpush.bf16.msrb.mxu1 %v1483_v37 }
  0x7f   : > { %984 = vmatpush.bf16.msrb.mxu0 %v1474_v38 }
  0x80   : > { %998 = vmatpush.bf16.msrb.mxu1 %v1482_v39 }
  0x83   : > { %985 = vmatpush.bf16.msrb.mxu0 %v1473_v41 }
  0x84   : > { %999 = vmatpush.bf16.msrb.mxu1 %v1481_v42 }
  0x87   : > { %986 = vmatpush.bf16.msrb.mxu0 %v1472_v46 }
  0x88   : > { %1000 = vmatpush.bf16.msrb.mxu1 %v1480_v47 }
  0x8b   : > { %987 = vmatpush.bf16.msrb.mxu0 %v1471_v53 }
  0x8c   : > { %1001 = vmatpush.bf16.msrb.mxu1 %v1479_v54 }
  0x8f   : > { %988 = vmatpush.bf16.msrb.mxu0 %v1470_v56 }
  0x90   : > { %1002 = vmatpush.bf16.msrb.mxu1 %v1478_v57 }
  0x93   : > { %989 = vmatpush.bf16.msrb.mxu0 %v1469_v2 }
  0x94   : > { %1003 = vmatpush.bf16.msrb.mxu1 %v1477_v3 }
  0xf2   : > { %v617_v45 = vpop.f32.mrf.mxu0 }
  0xf3   : > { %v2163_v48 = vadd.f32 %v617_v45, %v518_v43  ;;  %v631_v49 = vpop.f32.mrf.mxu1 }
  0xf4   : > { %v2165_v50 = vadd.f32 %v631_v49, %v519_v44 }
  0xf5   : > { %v1360_v51 = vmul.f32 -1.442695, %v2163_v48 }
  0xf6   : > { %v1361_v52 = vmul.f32 -1.442695, %v2165_v50 }
  0xf7   : > { %1586 = vpow2.f32 %v1360_v51 }
  0xf8   : > { %1588 = vpow2.f32 %v1361_v52 }
  0xfa   : > { %v619_v55 = vpop.f32.mrf.mxu0 }
  0xfb   : > { %v2173_v58 = vadd.f32 %v619_v55, %v518_v43  ;;  %v633_v59 = vpop.f32.mrf.mxu1 }
  0xfc   : > { %v2175_v60 = vadd.f32 %v633_v59, %v519_v44  ;;  %v747_v18 = vpop.f32.mrf.mxu2 }
  0xfd   : > { %v1587_v61 = vpop.eup %1586  ;;  %v1362_v62 = vmul.f32 -1.442695, %v2173_v58  ;;  %v761_v25 = vpop.f32.mrf.mxu3  ;;  %v748_v40 = vadd.f32 %v747_v18, %v654_v24 }
  0xfe   : > { %v1589_v63 = vpop.eup %1588  ;;  %v778_v0 = vadd.f32 1.0, %v1587_v61  ;;  %v1363_v1 = vmul.f32 -1.442695, %v2175_v60  ;;  %v762_v2 = vadd.f32 %v761_v25, %v655_v29 }
  0xff   : > { %v779_v4 = vadd.f32 1.0, %v1589_v63  ;;  %1590 = vpow2.f32 %v1362_v62 }
 0x100   : > { %1592 = vrcp.f32 %v778_v0  ;;  %v791_v21 = vand.u32 2147483647, %v778_v0  ;;  %v793_v22 = vand.u32 2147483648, %v778_v0  ;;  %vm787_vm1 = vweird.f32 %v778_v0 }
 0x101   : > { %1594 = vrcp.f32 %v779_v4  ;;  %v806_v28 = vand.u32 2147483647, %v779_v4  ;;  %vm802_vm4 = vweird.f32 %v779_v4  ;;  %v808_v32 = vand.u32 2147483648, %v779_v4 }
 0x102   : > { %1596 = vpow2.f32 %v1363_v1  ;;  %vm792_vm5 = vcmp.eq.f32.partialorder %v791_v21, 8.507059e+37  ;;  %v794_v34 = vor.u32 1.1754944e-38, %v793_v22 }
 0x103   : > { %vm807_vm8 = vcmp.eq.f32.partialorder %v806_v28, 8.507059e+37  ;;  %v809_v44 = vor.u32 1.1754944e-38, %v808_v32 }
 0x104   : > { %v749_v52 = vpop.f32.mrf.mxu2 }
 0x105   : > { %v1591_v5 = vpop.eup %1590  ;;  %v750_v62 = vadd.f32 %v749_v52, %v654_v24  ;;  %v763_v63 = vpop.f32.mrf.mxu3 }
 0x106   : > { %v1593_v6 = vpop.eup %1592  ;;  %v780_v7 = vadd.f32 1.0, %v1591_v5 }
 0x107   : > { %v1595_v8 = vpop.eup %1594  ;;  %v783_v9 = vmul.f32 %v1593_v6, %v778_v0  ;;  %vm788_vm0 = vweird.f32 %v1593_v6 }
 0x108   : > { %v1597_v10 = vpop.eup %1596  ;;  %v798_v11 = vmul.f32 %v1595_v8, %v779_v4  ;;  %1598 = vrcp.f32 %v780_v7  ;;  %vm2188_vm2 = vmor %vm787_vm1, %vm788_vm0  ;;  %vm803_vm3 = vweird.f32 %v1595_v8  ;;  %v823_v35 = vand.u32 2147483648, %v780_v7 }
 0x109   : > { %v784_v12 = vsub.f32 1.0, %v783_v9  ;;  %v2181_v13 = vadd.f32 1.0, %v1597_v10  ;;  %vm2196_vm6 = vmor %vm802_vm4, %vm803_vm3  ;;  %v821_v39 = vand.u32 2147483647, %v780_v7  ;;  %vm817_vm9 = vweird.f32 %v780_v7 }
 0x10a   : > { %v799_v14 = vsub.f32 1.0, %v798_v11  ;;  %v824_v47 = vor.u32 1.1754944e-38, %v823_v35  ;;  %v850_v11 = vld [vmem:[#allocation2] sm:$0xff] }
 0x10b   : > { %v785_v15 = vmul.f32 %v1593_v6, %v784_v12  ;;  %1600 = vrcp.f32 %v2181_v13  ;;  %v838_v46 = vand.u32 2147483648, %v2181_v13  ;;  %v836_v51 = vand.u32 2147483647, %v2181_v13 }
 0x10c   : > { %v800_v16 = vmul.f32 %v1595_v8, %v799_v14  ;;  %vm822_vm12 = vcmp.eq.f32.partialorder %v821_v39, 8.507059e+37  ;;  %vm832_vm13 = vweird.f32 %v2181_v13 }
 0x10d   : > { %v786_v19 = vadd.f32 %v1593_v6, %v785_v15  ;;  %v839_v61 = vor.u32 1.1754944e-38, %v838_v46  ;;  %vm837_vm15 = vcmp.eq.f32.partialorder %v836_v51, 8.507059e+37  ;;  %v851_v15 = vld [vmem:[#allocation2 + $0x8] sm:$0xff] }
 0x10e   : > { %v1599_v20 = vpop.eup %1598  ;;  %v801_v27 = vadd.f32 %v1595_v8, %v800_v16 }
 0x10f   : > { %v813_v23 = vmul.f32 %v1599_v20, %v780_v7  ;;  %v790_v31 = vsel %vm2188_vm2, %v1593_v6, %v786_v19  ;;  %vm818_vm7 = vweird.f32 %v1599_v20  ;;  %v764_v6 = vadd.f32 %v763_v63, %v655_v29 }
 0x110   : > { %v795_v41 = vsel %vm792_vm5, %v794_v34, %v790_v31  ;;  %v805_v42 = vsel %vm2196_vm6, %v1595_v8, %v801_v27  ;;  %vm819_vm10 = vmor %vm817_vm9, %vm818_vm7 }
 0x111   : > { %v1601_v30 = vpop.eup %1600  ;;  %v814_v33 = vsub.f32 1.0, %v813_v23  ;;  %v842_v53 = vmul.f32 %v795_v41, %v2163_v48  ;;  %v810_v54 = vsel %vm807_vm8, %v809_v44, %v805_v42 }
 0x112   : > { %v828_v36 = vmul.f32 %v1601_v30, %v2181_v13  ;;  %vm833_vm11 = vweird.f32 %v1601_v30  ;;  %v843_v0 = vmul.f32 %v810_v54, %v2165_v50 }
 0x113   : > { %v815_v38 = vmul.f32 %v1599_v20, %v814_v33  ;;  %vm834_vm14 = vmor %vm832_vm13, %vm833_vm11  ;;  %v846_v48 = vmul.f32 %v842_v53, %v748_v40 }
 0x114   : > { %v829_v43 = vsub.f32 1.0, %v828_v36  ;;  %v847_v8 = vmul.f32 %v843_v0, %v762_v2 }
 0x115   : > { %v816_v45 = vadd.f32 %v1599_v20, %v815_v38 }
 0x116   : > { %v830_v49 = vmul.f32 %v1601_v30, %v829_v43 }
 0x117   : > { %v820_v55 = vsel %vm819_vm10, %v1599_v20, %v816_v45 }
 0x118   : > { %v825_v56 = vsel %vm822_vm12, %v824_v47, %v820_v55  ;;  %v831_v57 = vadd.f32 %v1601_v30, %v830_v49 }
 0x119   : > { %v844_v59 = vmul.f32 %v825_v56, %v2173_v58 }
 0x11a   : > { %v835_v1 = vsel %vm834_vm14, %v1601_v30, %v831_v57 }
 0x11b   : > { %v840_v3 = vsel %vm837_vm15, %v839_v61, %v835_v1  ;;  %v848_v4 = vmul.f32 %v844_v59, %v750_v62 }
 0x11c   : > { %v845_v5 = vmul.f32 %v840_v3, %v2175_v60 }
 0x11d   : > { %v852_v7 = vpack.c.bf16 %v848_v4, %v846_v48 }
 0x11e   : > { %v849_v9 = vmul.f32 %v845_v5, %v764_v6 }
 0x11f   : > { %990 = vmatmul.bf16.vlgmr.msrb.gmra.mxu0 %v852_v7 }
 0x120   : > { %v853_v58 = vpack.c.bf16 %v849_v9, %v847_v8 }
 0x122   : > { %1004 = vmatmul.bf16.vlgmr.msrb.gmra.mxu1 %v853_v58 }
 0x19c   : > { %v991_v10 = vpop.f32.mrf.mxu0 }
 0x19f   : > { %v1005_v12 = vpop.f32.mrf.mxu1 }
 0x1a0   : > { %v1006_v13 = vadd.f32 %v1005_v12, %v991_v10 }
 0x1a2   : > { %v1010_v50 = vadd.f32 %v1006_v13, %v850_v11 }
 0x1a4   : > { %1012 = vst [vmem:[#allocation2] sm:$0xff] %v1010_v50  ;;  %v993_v14 = vpop.f32.mrf.mxu0 }
 0x1a7   : > { %v1007_v16 = vpop.f32.mrf.mxu1 }
 0x1a8   : > { %v1008_v17 = vadd.f32 %v1007_v16, %v993_v14  ;;  %1017 = sbr.rel (%p1428_p2) target bundleno = 439 (0x1b7), region = 80 }
 0x1aa   : > { %v1011_v18 = vadd.f32 %v1008_v17, %v851_v15 }
 0x1ac   : > { %1013 = vst [vmem:[#allocation2 + $0x8] sm:$0xff] %v1011_v18 }
 0x1ad   : > { %v1018_v60 = vld [vmem:[#allocation2] sm:$0xff] }
 0x1ae   : > { %v1602_v19 = vld [vmem:[%s2268_s9] ss:$0 sm:$0xff] }
 0x1af   : > { %v1024_v21 = vadd.f32 %v1602_v19, %v1018_v60 }
 0x1b1   : > { %1026 = vst [vmem:[#allocation14] sm:$0xff] %v1024_v21 }
 0x1b3   : > { %v1019_v20 = vld [vmem:[#allocation2 + $0x8] sm:$0xff] }
 0x1b4   : > { %v1025_v22 = vadd.f32 %v1602_v19, %v1019_v20 }
 0x1b6   : > { %1027 = vst [vmem:[#allocation14 + $0x8] sm:$0xff] %v1025_v22 }
 0x1b7 PF: > { %p1526_p3 = scmp.eq.s32.totalorder %s2011_s26, 1  ;;  %s2269_s19 = sld [smem:[#allocation29_spill]] }
 0x1b8   : > { %s1886_s17 = smov [#allocation14]   ;;  %s1887_s18 = smov 128  }
 0x1b9   : > { %s1036_s27 = sshll.u32 %s1886_s17, 4  ;;  %s1888_s20 = smov 8   ;;  %s1037_s27 = int_to_ptr.vmem [resolvable:$true] %s1036_s27 }
 0x1bd   : > { %s1038_s21 = sshll.u32 %s2269_s19, 4  ;;  %s1039_s21 = int_to_ptr.hbm [resolvable:$true] %s1038_s21 }
 0x1be   : > { %1500 = dma.vmem_to_hbm [thread:$0]  (%p1526_p3), %s1037_s27, 256, %s1039_s21, [#allocation5], %s1887_s18, %s1887_s18, %s1888_s20  }
 0x1bf   : > { %1852 = dma.done.wait (%p1526_p3), [#allocation5], 256  }
 0x1c0   : > { %1854 = vsyncadd (%p1526_p3), [#allocation5], 4294967040 }
 0x1c1 PF: > { %s2270_s1 = sld [smem:[#allocation21_spill]]  ;;  %s2274_s24 = smov %s1861_s25 }
 0x1c2   : > { %s2271_s0 = sld [smem:[#allocation20_spill]]  ;;  %s2276_s27 = smov %s1873_s28 }
 0x1c3   : > { %s2272_s26 = sld [smem:[#allocation23_spill]] }
 0x1c4   : > { %s2273_s3 = sld [smem:[#allocation22_spill]] }
 0x1c7   : > { %s28_s29 = sadd.s32 1, %s2270_s1  }
 0x1c8   : > { %p25_p4 = scmp.ge.s32.totalorder %s28_s29, 4   ;;  %s2275_s25 = smov %s2271_s0 }
 0x1ca   : > { %s2277_s28 = smov %s2273_s3  ;;  %27 = sbr.rel (!%p25_p4) target bundleno = 17 (0x11), region = 148 }
 0x1cf   :  { %1055 = vsyncpa [#allocation4], 1 }
 0x1d0   :  { %1057 = vsyncpa [#allocation4 + $0x1], 1 }
 0x1d1   :  { %1058 = vsyncpa [#allocation7], 1 }
 0x1d2   :  { %1060 = vsyncpa [#allocation7 + $0x1], 1 }
 0x1d3   :  { %1061 = vsyncpa [#allocation10], 1 }
 0x1d4   :  { %1063 = vsyncpa [#allocation10 + $0x1], 1 }
 0x1d5   :  { %1064 = vsyncpa [#allocation13], 1 }
 0x1d6   :  { %1066 = vsyncpa [#allocation13 + $0x1], 1 }
 0x1d7   :  { %1067 = vsyncpa [#allocation5], 1 }
 0x1d8   :  { %1069 = vsyncpa [#allocation5 + $0x1], 1 }

</bundles_post_ra>
